<compile_context>
chip_gen: v6e
topology: v6e:2x2x1
jax: 0.10.0
libtpu: 0.0.40
codegen_flags: <defaults>
</compile_context>

<pallas_src>
import jax
import jax.numpy as jnp
from jax import lax
from jax.experimental import pallas as pl
from jax.experimental.pallas import tpu as pltpu


# ----------------------------------------------------------------------------
# Fused Pallas kernel: conv matmul + per-capsule norm + squash (lane-dense)
# ----------------------------------------------------------------------------
def _make_kernel(use_approx_recip):
    def kernel(p_ref, w_ref, b_ref, seg_ref, o_ref):
        # p_ref:   (THW, CKK)   compute dtype (bf16/f32)
        # w_ref:   (CKK, PAD)   compute dtype, columns grouped (kk, oc), 0-padded
        # b_ref:   (1, PAD)     f32, padded lanes exactly zero
        # seg_ref: (PAD, PAD)   f32 block-diagonal group-membership matrix
        # o_ref:   (THW, PAD)   f32, single lane-dense store
        acc = jnp.dot(p_ref[...], w_ref[...],
                      preferred_element_type=jnp.float32)
        acc = acc + b_ref[...]                                   # (THW, PAD) f32

        # Segmented squared norm over each capsule's OC consecutive lanes,
        # broadcast back per lane, computed lane-dense on the MXU.
        sq = jnp.dot(acc * acc, seg_ref[...],
                     preferred_element_type=jnp.float32)

        # squash: [sq/(1+sq)] * x / sqrt(sq) == x * sqrt(sq) / (1 + sq) (0-safe)
        if use_approx_recip:
            inv = pl.reciprocal(1.0 + sq, approx=True)           # EUP slot
        else:
            inv = 1.0 / (1.0 + sq)                               # exact (f32 path)
        o_ref[...] = (acc * (jnp.sqrt(sq) * inv)).astype(o_ref.dtype)

    return kernel


# ----------------------------------------------------------------------------
# Row-tile picker: VMEM-budget aware, bf16 sublane aligned, megacore friendly
# ----------------------------------------------------------------------------
def _pick_row_tile(rows, ckk, pad, in_itemsize, budget_bytes=12 << 20):
    def vmem_bytes(t):
        return (2 * t * ckk * in_itemsize        # double-buffered patch blocks
                + 2 * t * pad * 4                # double-buffered f32 out blocks
                + 2 * ckk * pad * in_itemsize    # weight block (resident)
                + pad * pad * 4 + pad * 4        # seg + bias (resident)
                + (64 << 10))                    # slack for compiler temps

    row_align = 16 if in_itemsize == 2 else 8    # bf16 packs 16 sublanes/vreg
    cands = [t for t in range(row_align, rows + 1, row_align) if rows % t == 0]
    if not cands:
        cands = [t for t in range(8, rows + 1, 8) if rows % t == 0]
    if not cands:
        cands = [rows]                           # tiny/awkward rows: whole axis
    fitting = [t for t in cands if vmem_bytes(t) <= budget_bytes] or [min(cands)]
    multi = [t for t in fitting if rows // t >= 2]   # >=2 grid steps (2 TCs, v7x)
    return max(multi) if multi else max(fitting)


# ----------------------------------------------------------------------------
# Wrapper: host-side layout prep + pallas_call + cheap capsule reorder
# ----------------------------------------------------------------------------
def primary_caps_forward(x, weight, bias, out_channels, kernel_size, stride,
                         padding, compute_dtype=jnp.bfloat16):
    """Pallas equivalent of PrimaryCaps.forward.

    x:      (B, Cin, H, W) f32 (NCHW, as in PyTorch)
    weight: (OC*K*K, Cin, K, K) PyTorch Conv2d weight layout
    bias:   (OC*K*K,)
    returns (B, K*K*Ho*Wo, OC) f32
    """
    B, Cin, H, W = x.shape
    K = kernel_size
    OC = out_channels
    KK = K * K
    CKK = KK * Cin
    Ho = (H + 2 * padding - K) // stride + 1
    Wo = (W + 2 * padding - K) // stride + 1
    HoWo = Ho * Wo
    R = B * HoWo                                      # batch folded into rows
    PAD = max(128, ((KK * OC + 127) // 128) * 128)    # lane-dense matmul N dim
    # The block-diagonal norm trick needs these invariants (padded bias lanes
    # are constructed as exact zeros below; pad boundary is on a group boundary
    # since PAD % OC-group layout starts at KK*OC which is a multiple of OC).
    assert PAD % 128 == 0 and PAD >= KK * OC

    # --- im2col, NHWC-first: one input transpose + one concat.  Patch column
    #     order: (i*K + j)*Cin + ci.
    #     TODO(synk): in-kernel strided halo gather to kill this HBM round trip.
    xt = jnp.transpose(x, (0, 2, 3, 1))                                   # NHWC
    xt = jnp.pad(xt, ((0, 0), (padding, padding), (padding, padding), (0, 0)))
    pieces = []
    for i in range(K):
        for j in range(K):
            pieces.append(xt[:, i:i + stride * (Ho - 1) + 1:stride,
                              j:j + stride * (Wo - 1) + 1:stride, :])
    patches = jnp.concatenate(pieces, axis=-1).reshape(R, CKK)
    patches = patches.astype(compute_dtype)

    # --- weight: rows match patch column order; columns permuted to (kk, oc)
    #     grouping so the conv output lands directly in capsule order; columns
    #     zero-padded to PAD for unmasked lane-dense matmul tiles.
    w = jnp.transpose(weight, (2, 3, 1, 0)).reshape(CKK, OC, KK)
    w = w.transpose(0, 2, 1).reshape(CKK, KK * OC)
    w = jnp.pad(w, ((0, 0), (0, PAD - KK * OC))).astype(compute_dtype)
    b = bias.reshape(OC, KK).transpose(1, 0).reshape(KK * OC)
    b = jnp.pad(b, (0, PAD - KK * OC)).astype(jnp.float32).reshape(1, PAD)

    # --- block-diagonal group-membership matrix, hoisted out of the kernel.
    rg = lax.broadcasted_iota(jnp.int32, (PAD, PAD), 0) // OC
    cg = lax.broadcasted_iota(jnp.int32, (PAD, PAD), 1) // OC
    seg = (rg == cg).astype(jnp.float32)

    in_itemsize = jnp.dtype(compute_dtype).itemsize
    THW = _pick_row_tile(R, CKK, PAD, in_itemsize)
    use_approx = jnp.dtype(compute_dtype) == jnp.dtype(jnp.bfloat16)
    kernel = _make_kernel(use_approx)

    out = pl.pallas_call(
        kernel,
        out_shape=jax.ShapeDtypeStruct((R, PAD), jnp.float32),
        grid_spec=pltpu.PrefetchScalarGridSpec(
            num_scalar_prefetch=0,
            grid=(R // THW,),
            in_specs=[
                pl.BlockSpec((THW, CKK), lambda i: (i, 0)),
                pl.BlockSpec((CKK, PAD), lambda i: (0, 0)),   # resident
                pl.BlockSpec((1, PAD), lambda i: (0, 0)),     # resident
                pl.BlockSpec((PAD, PAD), lambda i: (0, 0)),   # resident
            ],
            out_specs=pl.BlockSpec((THW, PAD), lambda i: (i, 0)),
        ),
        compiler_params=pltpu.CompilerParams(
            dimension_semantics=("parallel",),
            vmem_limit_bytes=32 << 20),
    )(patches, w, b, seg)

    # (R, PAD) -> drop pad lanes -> (B, HoWo, KK, OC) -> (B, KK*HoWo, OC).
    # Small tensor; this XLA reorder is far cheaper than masked in-kernel stores.
    out = out[:, :KK * OC].reshape(B, HoWo, KK, OC)
    out = jnp.transpose(out, (0, 2, 1, 3)).reshape(B, KK * HoWo, OC)
    return out


# ----------------------------------------------------------------------------
# Pure-JAX reference (mirrors PyTorch semantics) for a silent correctness check
# ----------------------------------------------------------------------------
def _reference(x, weight, bias, out_channels, kernel_size, stride, padding):
    conv = lax.conv_general_dilated(
        x, weight, window_strides=(stride, stride),
        padding=[(padding, padding), (padding, padding)],
        dimension_numbers=("NCHW", "OIHW", "NCHW"),
    ) + bias[None, :, None, None]
    B = conv.shape[0]
    out = conv.reshape(B, out_channels, -1)          # torch .view
    out = out.transpose(0, 2, 1)                     # torch .transpose(1, 2)
    sq = jnp.sum(out * out, axis=-1, keepdims=True)
    return (sq / (1.0 + sq)) * out / jnp.sqrt(sq)


if __name__ == "__main__":
    # Small, deterministic config consistent with PrimaryCaps.__init__
    B, Cin, H, W = 2, 4, 16, 16
    out_channels, kernel_size, stride, padding = 8, 3, 2, 1
    Cout_conv = out_channels * kernel_size ** 2

    key = jax.random.PRNGKey(0)
    kx, kw, kb = jax.random.split(key, 3)
    x = jax.random.normal(kx, (B, Cin, H, W), dtype=jnp.float32)
    weight = 0.1 * jax.random.normal(
        kw, (Cout_conv, Cin, kernel_size, kernel_size), dtype=jnp.float32)
    bias = 0.1 * jax.random.normal(kb, (Cout_conv,), dtype=jnp.float32)

    fwd = jax.jit(primary_caps_forward,
                  static_argnames=("out_channels", "kernel_size", "stride",
                                   "padding", "compute_dtype"))
    ref = _reference(x, weight, bias, out_channels, kernel_size, stride, padding)

    # f32 MXU operands + exact divide: tight check (all generations).
    out_f32 = jax.block_until_ready(
        fwd(x, weight, bias, out_channels=out_channels, kernel_size=kernel_size,
            stride=stride, padding=padding, compute_dtype=jnp.float32))
    assert out_f32.shape == ref.shape, (out_f32.shape, ref.shape)
    assert jnp.allclose(out_f32, ref, atol=1e-4, rtol=1e-4), \
        float(jnp.max(jnp.abs(out_f32 - ref)))

    # bf16 MXU operands (default, all generations) + approx EUP recip: loose.
    out_bf16 = jax.block_until_ready(
        fwd(x, weight, bias, out_channels=out_channels, kernel_size=kernel_size,
            stride=stride, padding=padding, compute_dtype=jnp.bfloat16))
    assert out_bf16.shape == ref.shape, (out_bf16.shape, ref.shape)
    assert jnp.allclose(out_bf16, ref, atol=3e-2, rtol=3e-2), \
        float(jnp.max(jnp.abs(out_bf16 - ref)))

    print("KERNEL_OK")
</pallas_src>

<mosaic_0001>
module attributes {stable_mosaic.version = 11 : i64} {
  func.func @kernel(%arg0: i32, %arg1: memref<64x36xf32, #tpu.memory_space<vmem>>, %arg2: memref<36x128xf32, #tpu.memory_space<vmem>>, %arg3: memref<1x128xf32, #tpu.memory_space<vmem>>, %arg4: memref<128x128xf32, #tpu.memory_space<vmem>>, %arg5: memref<64x128xf32, #tpu.memory_space<vmem>>) attributes {dimension_semantics = [#tpu.dimension_semantics<parallel>], iteration_bounds = array<i64: 2>, scalar_prefetch = 0 : i64, scratch_operands = 0 : i64, tpu.core_type = #tpu.core_type<tc>, window_params = [{transform_indices = @transform_0, window_bounds = array<i64: 64, 36>}, {pipeline_mode = #tpu.pipeline_mode<synchronous>, transform_indices = @transform_1, window_bounds = array<i64: 36, 128>}, {pipeline_mode = #tpu.pipeline_mode<synchronous>, transform_indices = @transform_2, window_bounds = array<i64: 1, 128>}, {pipeline_mode = #tpu.pipeline_mode<synchronous>, transform_indices = @transform_3, window_bounds = array<i64: 128, 128>}, {transform_indices = @transform_4, window_bounds = array<i64: 64, 128>}]} {
    %c0 = arith.constant 0 : index
    %c0_0 = arith.constant 0 : index
    %0 = vector.load %arg1[%c0, %c0_0] : memref<64x36xf32, #tpu.memory_space<vmem>>, vector<64x36xf32>
    %c0_1 = arith.constant 0 : index
    %c0_2 = arith.constant 0 : index
    %1 = vector.load %arg2[%c0_1, %c0_2] : memref<36x128xf32, #tpu.memory_space<vmem>>, vector<36x128xf32>
    %cst = arith.constant dense<0.000000e+00> : vector<64x128xf32>
    %2 = tpu.matmul %0, %1, %cst {dimension_numbers = #tpu.dot_dimension_numbers<[1], [0], [0], [1], [0, 0, 1, 1], [], []>} : vector<64x36xf32>, vector<36x128xf32>, vector<64x128xf32> -> vector<64x128xf32>
    %c0_3 = arith.constant 0 : index
    %c0_4 = arith.constant 0 : index
    %3 = vector.load %arg3[%c0_3, %c0_4] : memref<1x128xf32, #tpu.memory_space<vmem>>, vector<1x128xf32>
    %4 = vector.broadcast %3 : vector<1x128xf32> to vector<64x128xf32>
    %5 = arith.addf %2, %4 : vector<64x128xf32>
    %6 = arith.mulf %5, %5 : vector<64x128xf32>
    %c0_5 = arith.constant 0 : index
    %c0_6 = arith.constant 0 : index
    %7 = vector.load %arg4[%c0_5, %c0_6] : memref<128x128xf32, #tpu.memory_space<vmem>>, vector<128x128xf32>
    %cst_7 = arith.constant dense<0.000000e+00> : vector<64x128xf32>
    %8 = tpu.matmul %6, %7, %cst_7 {dimension_numbers = #tpu.dot_dimension_numbers<[1], [0], [0], [1], [0, 0, 1, 1], [], []>} : vector<64x128xf32>, vector<128x128xf32>, vector<64x128xf32> -> vector<64x128xf32>
    %cst_8 = arith.constant 1.000000e+00 : f32
    %9 = vector.broadcast %cst_8 : f32 to vector<64x128xf32>
    %10 = arith.addf %9, %8 : vector<64x128xf32>
    %cst_9 = arith.constant 1.000000e+00 : f32
    %11 = vector.broadcast %cst_9 : f32 to vector<64x128xf32>
    %12 = arith.divf %11, %10 : vector<64x128xf32>
    %13 = math.sqrt %8 : vector<64x128xf32>
    %14 = arith.mulf %13, %12 : vector<64x128xf32>
    %15 = arith.mulf %5, %14 : vector<64x128xf32>
    %c0_10 = arith.constant 0 : index
    %c0_11 = arith.constant 0 : index
    %16 = vector.load %arg5[%c0_10, %c0_11] : memref<64x128xf32, #tpu.memory_space<vmem>>, vector<64x128xf32>
    tpu.vector_store %arg5[%c0_10, %c0_11], %15 {strides = array<i32>} : memref<64x128xf32, #tpu.memory_space<vmem>>, vector<64x128xf32>,
    return
  }
  func.func @transform_0(%arg0: i32) -> (i32, i32) {
    %c0_i32 = arith.constant 0 : i32
    %c0_i32_0 = arith.constant 0 : i32
    return %arg0, %c0_i32 : i32, i32
  }
  func.func @transform_1(%arg0: i32) -> (i32, i32) {
    %c0_i32 = arith.constant 0 : i32
    %c0_i32_0 = arith.constant 0 : i32
    %c0_i32_1 = arith.constant 0 : i32
    return %c0_i32, %c0_i32_0 : i32, i32
  }
  func.func @transform_2(%arg0: i32) -> (i32, i32) {
    %c0_i32 = arith.constant 0 : i32
    %c0_i32_0 = arith.constant 0 : i32
    %c0_i32_1 = arith.constant 0 : i32
    return %c0_i32, %c0_i32_0 : i32, i32
  }
  func.func @transform_3(%arg0: i32) -> (i32, i32) {
    %c0_i32 = arith.constant 0 : i32
    %c0_i32_0 = arith.constant 0 : i32
    %c0_i32_1 = arith.constant 0 : i32
    return %c0_i32, %c0_i32_0 : i32, i32
  }
  func.func @transform_4(%arg0: i32) -> (i32, i32) {
    %c0_i32 = arith.constant 0 : i32
    %c0_i32_0 = arith.constant 0 : i32
    return %arg0, %c0_i32 : i32, i32
  }
}

</mosaic_0001>

<bundles_post_ra>
// kernel: primary_caps_forward.1
= control target key start
LH: loop header
LB: loop body
LE: loop exit
PB: predicated region body
PF: predicated region fallthrough
CT: control target
= control target key end

     0   :  { %s841_s15 = smov 0   ;;  %s1044_s0 = inlined_call_operand.vmem [shape: f32[128,36], index: 0, kind: input, shape index: {}]   ;;  %s1045_s1 = inlined_call_operand.vmem [shape: f32[36,128], index: 1, kind: input, shape index: {}]   ;;  %s1046_s2 = inlined_call_operand.vmem [shape: f32[1,128], index: 2, kind: input, shape index: {}]   ;;  %s1047_s3 = inlined_call_operand.vmem [shape: f32[128,128], index: 3, kind: input, shape index: {}]   ;;  %s1048_s4 = inlined_call_operand.vmem [shape: f32[128,128], index: 4, kind: output, shape index: {}]  }
   0x1 LB: > { %s644_s16 = sadd.s32 4294967295, %s814_s15   ;;  %p648_p0 = scmp.ge.s32.totalorder %s814_s15, 1  ;;  %s814_s15 = sphi %s841_s15, %s14_s15  }
   0x2   : > { %p163_p1 = scmp.lt.s32.totalorder %s814_s15, 3 }
   0x4   : > { %p164_p2 = pnand %p648_p0, %p163_p1 }
   0x5   : > { %s649_s21 = sshll.u32 (!%p164_p2), %s644_s16, 3 }
   0x6   : > { %167 = sbr.rel (%p164_p2) target bundleno = 452 (0x1c4), region = 36  ;;  %p190_p3 = scmp.lt.s32.totalorder (!%p164_p2), %s649_s21, 15 }
   0xb   : > { %v213_v0 = vld [vmem:[%s1045_s1 + $0x20] sm:$0xf]  ;;  %vm246_vm0 = vcmask 1043456   ;;  %v212_v1 = vld [vmem:[%s1045_s1 + $0x18] sm:$0xff]  ;;  %v211_v3 = vld [vmem:[%s1045_s1 + $0x10] sm:$0xff]  ;;  %s1050_s21 = smov (!%p190_p3, %s649_s21), 15 }
   0xc   : > { %702 = vmatprep.subr.msk.mxu0 %vm246_vm0, %v213_v0  ;;  %v378_v2 = vld [vmem:[%s1047_s3 + $0x78] sm:$0xff]  ;;  %v377_v4 = vld [vmem:[%s1047_s3 + $0x70] sm:$0xff]  ;;  %v376_v5 = vld [vmem:[%s1047_s3 + $0x68] sm:$0xff]  ;;  %s650_s6 = sshll.u32 %s1050_s21, 3  ;;  %vm221_vm1 = vcmask 293888  }
   0xd   : > { %703 = vmatpush3.msk.msra.mxu0 %vm246_vm0, %v213_v0  ;;  %724 = vmatprep.subr.mxu1 %v378_v2  ;;  %v210_v6 = vld [vmem:[%s1045_s1 + $0x8] sm:$0xff]  ;;  %v209_v7 = vld [vmem:[%s1045_s1] sm:$0xff]  ;;  %s881_s11 = scalar_lea.vmem %s1044_s0, %s650_s6  ;;  %v374_v11 = vld [vmem:[%s1047_s3 + $0x58] sm:$0xff]  ;;  %s998_s20 = scalar_lea.vmem %s1048_s4, %s650_s6 }
   0xe   : > { %704 = vmatprep.subr.mxu0 %v212_v1  ;;  %725 = vmatpush3.msra.mxu1 %v378_v2  ;;  %v375_v8 = vld [vmem:[%s1047_s3 + $0x60] sm:$0xff]  ;;  %v202_v10 = vld [vmem:[%s881_s11 + $0x8] sm:$0xff]  ;;  %v203_v12 = vld [vmem:[%s881_s11 + $0x10] sm:$0xff] }
   0xf   : > { %705 = vmatpush3.msra.mxu0 %v212_v1  ;;  %726 = vmatprep.subr.mxu1 %v377_v4  ;;  %v201_v9 = vld [vmem:[%s881_s11] sm:$0xff]  ;;  %v373_v13 = vld [vmem:[%s1047_s3 + $0x50] sm:$0xff]  ;;  %v204_v14 = vld [vmem:[%s881_s11 + $0x18] sm:$0xff] }
  0x10   : > { %706 = vmatprep.subr.mxu0 %v211_v3  ;;  %727 = vmatpush3.msra.mxu1 %v377_v4  ;;  %v372_v15 = vld [vmem:[%s1047_s3 + $0x48] sm:$0xff]  ;;  %v205_v16 = vld [vmem:[%s881_s11 + $0x20] sm:$0xff]  ;;  %v370_v19 = vld [vmem:[%s1047_s3 + $0x38] sm:$0xff] }
  0x11   : > { %707 = vmatpush3.msra.mxu0 %v211_v3  ;;  %728 = vmatprep.subr.mxu1 %v376_v5  ;;  %v371_v17 = vld [vmem:[%s1047_s3 + $0x40] sm:$0xff]  ;;  %v206_v18 = vld [vmem:[%s881_s11 + $0x28] sm:$0xff]  ;;  %v207_v20 = vld [vmem:[%s881_s11 + $0x30] sm:$0xff] }
  0x12   : > { %708 = vmatprep.subr.mxu0 %v210_v6  ;;  %729 = vmatpush3.msra.mxu1 %v376_v5  ;;  %v369_v21 = vld [vmem:[%s1047_s3 + $0x30] sm:$0xff]  ;;  %v208_v22 = vld [vmem:[%s881_s11 + $0x38] sm:$0xff]  ;;  %v368_v23 = vld [vmem:[%s1047_s3 + $0x28] sm:$0xff] }
  0x13   : > { %709 = vmatpush3.msra.mxu0 %v210_v6  ;;  %712 = vmatprep.mubr.msk.f32.mxu0 %vm221_vm1, %v201_v9  ;;  %v367_v24 = vld [vmem:[%s1047_s3 + $0x20] sm:$0xff]  ;;  %v366_v25 = vld [vmem:[%s1047_s3 + $0x18] sm:$0xff]  ;;  %v365_v26 = vld [vmem:[%s1047_s3 + $0x10] sm:$0xff] }
  0x14   : > { %710 = vmatprep.subr.mxu0 %v209_v7  ;;  %730 = vmatprep.subr.mxu1 %v375_v8  ;;  %v364_v27 = vld [vmem:[%s1047_s3 + $0x8] sm:$0xff]  ;;  %v363_v28 = vld [vmem:[%s1047_s3] sm:$0xff] }
  0x15   : > { %711 = vmatpush3.msra.mxu0 %v209_v7  ;;  %731 = vmatpush3.msra.mxu1 %v375_v8  ;;  %v653_v29 = vld [vmem:[%s1046_s2] ss:$0 sm:$0xff] }
  0x16   : > { %713 = vmatmul.mubr.msk.f32.vlgmr.msra.gmra.mxu0 %vm221_vm1, %v202_v10  ;;  %732 = vmatprep.subr.mxu1 %v374_v11 }
  0x17   : > { %715 = vmatprep.mubr.msk.f32.mxu0 %vm221_vm1, %v203_v12  ;;  %733 = vmatpush3.msra.mxu1 %v374_v11 }
  0x18   : > { %734 = vmatprep.subr.mxu1 %v373_v13 }
  0x19   : > { %735 = vmatpush3.msra.mxu1 %v373_v13 }
  0x1a   : > { %716 = vmatmul.mubr.msk.f32.gmra.mxu0 %vm221_vm1, %v204_v14  ;;  %736 = vmatprep.subr.mxu1 %v372_v15 }
  0x1b   : > { %718 = vmatprep.mubr.msk.f32.mxu0 %vm221_vm1, %v205_v16  ;;  %737 = vmatpush3.msra.mxu1 %v372_v15 }
  0x1c   : > { %738 = vmatprep.subr.mxu1 %v371_v17 }
  0x1d   : > { %739 = vmatpush3.msra.mxu1 %v371_v17 }
  0x1e   : > { %719 = vmatmul.mubr.msk.f32.gmra.mxu0 %vm221_vm1, %v206_v18  ;;  %740 = vmatprep.subr.mxu1 %v370_v19 }
  0x1f   : > { %721 = vmatprep.mubr.msk.f32.mxu0 %vm221_vm1, %v207_v20  ;;  %741 = vmatpush3.msra.mxu1 %v370_v19 }
  0x20   : > { %742 = vmatprep.subr.mxu1 %v369_v21 }
  0x21   : > { %743 = vmatpush3.msra.mxu1 %v369_v21 }
  0x22   : > { %722 = vmatmul.mubr.msk.f32.gmra.mxu0 %vm221_vm1, %v208_v22  ;;  %744 = vmatprep.subr.mxu1 %v368_v23 }
  0x23   : > { %745 = vmatpush3.msra.mxu1 %v368_v23 }
  0x24   : > { %746 = vmatprep.subr.mxu1 %v367_v24 }
  0x25   : > { %747 = vmatpush3.msra.mxu1 %v367_v24 }
  0x26   : > { %748 = vmatprep.subr.mxu1 %v366_v25 }
  0x27   : > { %749 = vmatpush3.msra.mxu1 %v366_v25 }
  0x28   : > { %750 = vmatprep.subr.mxu1 %v365_v26 }
  0x29   : > { %751 = vmatpush3.msra.mxu1 %v365_v26 }
  0x2a   : > { %752 = vmatprep.subr.mxu1 %v364_v27 }
  0x2b   : > { %753 = vmatpush3.msra.mxu1 %v364_v27 }
  0x2c   : > { %754 = vmatprep.subr.mxu1 %v363_v28 }
  0x2d   : > { %755 = vmatpush3.msra.mxu1 %v363_v28 }
  0xd6   : > { %v714_v30 = vpop.f32.mrf.mxu0 }
  0xd7   : > { %v941_v31 = vadd.f32 %v714_v30, %v653_v29 }
  0xd8   : > { %v316_v32 = vpop.f32.mrf.mxu0 }
  0xd9   : > { %v943_v33 = vadd.f32 %v653_v29, %v316_v32  ;;  %v356_v36 = vmul.f32 %v941_v31, %v941_v31 }
  0xda   : > { %v717_v34 = vpop.f32.mrf.mxu0 }
  0xdb   : > { %v355_v35 = vmul.f32 %v943_v33, %v943_v33  ;;  %v949_v37 = vadd.f32 %v717_v34, %v653_v29 }
  0xdc   : > { %v326_v38 = vpop.f32.mrf.mxu0 }
  0xdd   : > { %v951_v39 = vadd.f32 %v653_v29, %v326_v38  ;;  %756 = vmatprep.mubr.f32.mxu1 %v355_v35  ;;  %v358_v42 = vmul.f32 %v949_v37, %v949_v37 }
  0xde   : > { %v720_v40 = vpop.f32.mrf.mxu0  ;;  %757 = vmatmul.mubr.f32.vlgmr.msra.gmra.mxu1 %v356_v36 }
  0xdf   : > { %v357_v41 = vmul.f32 %v951_v39, %v951_v39  ;;  %v957_v43 = vadd.f32 %v720_v40, %v653_v29 }
  0xe0   : > { %v336_v44 = vpop.f32.mrf.mxu0 }
  0xe1   : > { %v959_v45 = vadd.f32 %v653_v29, %v336_v44  ;;  %759 = vmatprep.mubr.f32.mxu1 %v357_v41  ;;  %v360_v48 = vmul.f32 %v957_v43, %v957_v43 }
  0xe2   : > { %v723_v46 = vpop.f32.mrf.mxu0  ;;  %760 = vmatmul.mubr.f32.gmra.mxu1 %v358_v42 }
  0xe3   : > { %v359_v47 = vmul.f32 %v959_v45, %v959_v45  ;;  %v965_v49 = vadd.f32 %v723_v46, %v653_v29 }
  0xe4   : > { %v346_v50 = vpop.f32.mrf.mxu0 }
  0xe5   : > { %v967_v51 = vadd.f32 %v653_v29, %v346_v50  ;;  %762 = vmatprep.mubr.f32.mxu1 %v359_v47  ;;  %v362_v53 = vmul.f32 %v965_v49, %v965_v49 }
  0xe6   : > { %763 = vmatmul.mubr.f32.gmra.mxu1 %v360_v48 }
  0xe7   : > { %v361_v52 = vmul.f32 %v967_v51, %v967_v51 }
  0xe9   : > { %765 = vmatprep.mubr.f32.mxu1 %v361_v52 }
  0xea   : > { %766 = vmatmul.mubr.f32.gmra.mxu1 %v362_v53 }
 0x19e   : > { %v758_v54 = vpop.f32.mrf.mxu1 }
 0x19f   : > { %v485_v55 = vadd.f32 1.0, %v758_v54  ;;  %776 = vrsqrt.f32 %v758_v54  ;;  %vm517_vm2 = vcmp.eq.f32.partialorder %v758_v54, inf  ;;  %v520_v7 = vand.u32 2147483648, %v758_v54 }
 0x1a0   : > { %v445_v56 = vpop.f32.mrf.mxu1  ;;  %vm519_vm3 = vcmp.eq.f32.partialorder %v758_v54, 0.0 }
 0x1a1   : > { %v484_v57 = vadd.f32 1.0, %v445_v56  ;;  %778 = vrsqrt.f32 %v445_v56  ;;  %vm510_vm4 = vcmp.eq.f32.partialorder %v445_v56, inf  ;;  %v513_v16 = vand.u32 2147483648, %v445_v56 }
 0x1a2   : > { %v761_v58 = vpop.f32.mrf.mxu1  ;;  %780 = vrcp.f32 %v485_v55  ;;  %vm512_vm5 = vcmp.eq.f32.partialorder %v445_v56, 0.0 }
 0x1a3   : > { %v487_v59 = vadd.f32 1.0, %v761_v58  ;;  %782 = vrsqrt.f32 %v761_v58  ;;  %vm531_vm6 = vcmp.eq.f32.partialorder %v761_v58, inf  ;;  %v534_v23 = vand.u32 2147483648, %v761_v58 }
 0x1a4   : > { %v973_v60 = vpop.f32.mrf.mxu1  ;;  %784 = vrcp.f32 %v484_v57  ;;  %vm533_vm7 = vcmp.eq.f32.partialorder %v761_v58, 0.0 }
 0x1a5   : > { %v486_v61 = vadd.f32 1.0, %v973_v60  ;;  %786 = vrsqrt.f32 %v973_v60  ;;  %vm524_vm8 = vcmp.eq.f32.partialorder %v973_v60, inf  ;;  %vm526_vm9 = vcmp.eq.f32.partialorder %v973_v60, 0.0 }
 0x1a6   : > { %v977_v62 = vpop.f32.mrf.mxu1  ;;  %788 = vrcp.f32 %v487_v59  ;;  %v527_v30 = vand.u32 2147483648, %v973_v60 }
 0x1a7   : > { %v489_v63 = vadd.f32 1.0, %v977_v62  ;;  %790 = vrsqrt.f32 %v977_v62  ;;  %vm545_vm10 = vcmp.eq.f32.partialorder %v977_v62, inf  ;;  %vm547_vm11 = vcmp.eq.f32.partialorder %v977_v62, 0.0 }
 0x1a8   : > { %v981_v0 = vpop.f32.mrf.mxu1  ;;  %792 = vrcp.f32 %v486_v61  ;;  %v548_v41 = vand.u32 2147483648, %v977_v62 }
 0x1a9   : > { %v488_v1 = vadd.f32 1.0, %v981_v0  ;;  %794 = vrsqrt.f32 %v981_v0  ;;  %vm538_vm12 = vcmp.eq.f32.partialorder %v981_v0, inf  ;;  %vm540_vm13 = vcmp.eq.f32.partialorder %v981_v0, 0.0 }
 0x1aa   : > { %v985_v2 = vpop.f32.mrf.mxu1  ;;  %796 = vrcp.f32 %v489_v63  ;;  %v541_v52 = vand.u32 2147483648, %v981_v0 }
 0x1ab   : > { %v491_v4 = vadd.f32 1.0, %v985_v2  ;;  %798 = vrsqrt.f32 %v985_v2  ;;  %vm559_vm14 = vcmp.eq.f32.partialorder %v985_v2, inf  ;;  %vm561_vm15 = vcmp.eq.f32.partialorder %v985_v2, 0.0 }
 0x1ac   : > { %v777_v3 = vpop.eup %776  ;;  %v989_v5 = vpop.f32.mrf.mxu1  ;;  %800 = vrcp.f32 %v488_v1  ;;  %v562_v59 = vand.u32 2147483648, %v985_v2 }
 0x1ad   : > { %v516_v6 = vmul.f32 %v777_v3, %v758_v54  ;;  %v490_v8 = vadd.f32 1.0, %v989_v5  ;;  %802 = vrsqrt.f32 %v989_v5  ;;  %vm552_vm0 = vcmp.eq.f32.partialorder %v989_v5, inf }
 0x1ae   : > { %v779_v9 = vpop.eup %778  ;;  %804 = vrcp.f32 %v491_v4  ;;  %v555_v1 = vand.u32 2147483648, %v989_v5  ;;  %vm554_vm1 = vcmp.eq.f32.partialorder %v989_v5, 0.0 }
 0x1af   : > { %v518_v10 = vsel %vm517_vm2, %v758_v54, %v516_v6  ;;  %v781_v11 = vpop.eup %780  ;;  %v509_v13 = vmul.f32 %v779_v9, %v445_v56  ;;  %806 = vrcp.f32 %v490_v8 }
 0x1b0   : > { %v521_v12 = vsel %vm519_vm3, %v520_v7, %v518_v10  ;;  %v783_v14 = vpop.eup %782 }
 0x1b1   : > { %v565_v15 = vmul.f32 %v781_v11, %v521_v12  ;;  %v785_v17 = vpop.eup %784  ;;  %v511_v18 = vsel %vm510_vm4, %v445_v56, %v509_v13  ;;  %v530_v19 = vmul.f32 %v783_v14, %v761_v58 }
 0x1b2   : > { %v787_v20 = vpop.eup %786  ;;  %v514_v22 = vsel %vm512_vm5, %v513_v16, %v511_v18 }
 0x1b3   : > { %v573_v21 = vmul.f32 %v565_v15, %v941_v31  ;;  %v789_v24 = vpop.eup %788  ;;  %v564_v25 = vmul.f32 %v785_v17, %v514_v22  ;;  %v532_v26 = vsel %vm531_vm6, %v761_v58, %v530_v19  ;;  %v523_v27 = vmul.f32 %v787_v20, %v973_v60 }
 0x1b4   : > { %v791_v28 = vpop.eup %790  ;;  %v535_v29 = vsel %vm533_vm7, %v534_v23, %v532_v26 }
 0x1b5   : > { %581 = vst [vmem:[%s998_s20 + $0x8] sm:$0xff] %v573_v21  ;;  %v793_v31 = vpop.eup %792  ;;  %v572_v32 = vmul.f32 %v564_v25, %v943_v33  ;;  %v567_v34 = vmul.f32 %v789_v24, %v535_v29  ;;  %v525_v35 = vsel %vm524_vm8, %v973_v60, %v523_v27  ;;  %v544_v36 = vmul.f32 %v791_v28, %v977_v62 }
 0x1b6   : > { %v795_v38 = vpop.eup %794  ;;  %v528_v40 = vsel %vm526_vm9, %v527_v30, %v525_v35 }
 0x1b7   : > { %v797_v42 = vpop.eup %796  ;;  %580 = vst [vmem:[%s998_s20] sm:$0xff] %v572_v32  ;;  %v575_v44 = vmul.f32 %v567_v34, %v949_v37  ;;  %v566_v46 = vmul.f32 %v793_v31, %v528_v40  ;;  %v546_v33 = vsel %vm545_vm10, %v977_v62, %v544_v36  ;;  %v537_v47 = vmul.f32 %v795_v38, %v981_v0 }
 0x1b8   : > { %v799_v48 = vpop.eup %798  ;;  %v549_v50 = vsel %vm547_vm11, %v548_v41, %v546_v33 }
 0x1b9   : > { %v801_v53 = vpop.eup %800  ;;  %583 = vst [vmem:[%s998_s20 + $0x18] sm:$0xff] %v575_v44  ;;  %v574_v54 = vmul.f32 %v566_v46, %v951_v39  ;;  %v569_v55 = vmul.f32 %v797_v42, %v549_v50  ;;  %v539_v37 = vsel %vm538_vm12, %v981_v0, %v537_v47  ;;  %v558_v56 = vmul.f32 %v799_v48, %v985_v2 }
 0x1ba   : > { %v803_v57 = vpop.eup %802  ;;  %v542_v58 = vsel %vm540_vm13, %v541_v52, %v539_v37 }
 0x1bb   : > { %582 = vst [vmem:[%s998_s20 + $0x10] sm:$0xff] %v574_v54  ;;  %v577_v60 = vmul.f32 %v569_v55, %v957_v43  ;;  %v568_v61 = vmul.f32 %v801_v53, %v542_v58  ;;  %v560_v39 = vsel %vm559_vm14, %v985_v2, %v558_v56  ;;  %v551_v62 = vmul.f32 %v803_v57, %v989_v5  ;;  %v805_v63 = vpop.eup %804 }
 0x1bc   : > { %v563_v0 = vsel %vm561_vm15, %v562_v59, %v560_v39  ;;  %v807_v43 = vpop.eup %806 }
 0x1bd   : > { %585 = vst [vmem:[%s998_s20 + $0x28] sm:$0xff] %v577_v60  ;;  %v576_v3 = vmul.f32 %v568_v61, %v959_v45  ;;  %v571_v4 = vmul.f32 %v805_v63, %v563_v0  ;;  %v553_v6 = vsel %vm552_vm0, %v989_v5, %v551_v62 }
 0x1be   : > { %v556_v2 = vsel %vm554_vm1, %v555_v1, %v553_v6 }
 0x1bf   : > { %584 = vst [vmem:[%s998_s20 + $0x20] sm:$0xff] %v576_v3  ;;  %v579_v7 = vmul.f32 %v571_v4, %v965_v49  ;;  %v570_v8 = vmul.f32 %v807_v43, %v556_v2 }
 0x1c1   : > { %587 = vst [vmem:[%s998_s20 + $0x38] sm:$0xff] %v579_v7  ;;  %v578_v9 = vmul.f32 %v570_v8, %v967_v51 }
 0x1c3   : > { %586 = vst [vmem:[%s998_s20 + $0x30] sm:$0xff] %v578_v9 }
 0x1c4 PF: > { %s14_s15 = sadd.s32 1, %s814_s15  }
 0x1c5   : > { %p11_p4 = scmp.ge.s32.totalorder %s14_s15, 4  }
 0x1c7   :  { %13 = sbr.rel (!%p11_p4) target bundleno = 1 (0x1), region = 66 }

</bundles_post_ra>
